<compile_context>
chip_gen: v7x
topology: tpu7x:2x2x1
jax: 0.10.0
libtpu: 0.0.40
codegen_flags: <defaults>
</compile_context>

<pallas_src>
import jax
import jax.numpy as jnp
import numpy as np
from jax.experimental import pallas as pl
from jax.experimental.pallas import tpu as pltpu


# --------------------------------------------------------------------------
# Pass 1: fused im2col matmul (conv + bias) + per-channel partial statistics.
# --------------------------------------------------------------------------
def _conv_stats_kernel(pT_ref, wT_ref, b_ref, out_ref, sum_ref, sq_ref):
    i = pl.program_id(0)

    # sum/sq blocks are revisited every step (accumulator pattern) -> init once.
    @pl.when(i == 0)
    def _init():
        sum_ref[...] = jnp.zeros_like(sum_ref)
        sq_ref[...] = jnp.zeros_like(sq_ref)

    # One MXU matmul per tile: (Cout, K) bf16 @ (K, Tm) bf16 -> (Cout, Tm) f32.
    y = jnp.dot(wT_ref[...], pT_ref[...], preferred_element_type=jnp.float32)
    y = y + b_ref[...]                       # (Cout, 1) broadcast along lanes
    out_ref[...] = y                         # lane-dense store

    # Per-channel partial sums (kept per-lane; the tiny lane fold happens in
    # the wrapper).  Pure full-vreg VPU adds, fused with the conv traversal.
    sum_ref[...] += y
    sq_ref[...] += y * y


# --------------------------------------------------------------------------
# Pass 2: BatchNorm apply (scale/shift precomputed from global stats) + PReLU.
# --------------------------------------------------------------------------
def _bn_prelu_kernel(y_ref, scale_ref, shift_ref, alpha_ref, out_ref):
    y = y_ref[...] * scale_ref[...] + shift_ref[...]   # f32 epilogue
    a = alpha_ref[0]                                   # shared PReLU alpha (SMEM)
    out_ref[...] = jnp.where(y >= 0, y, a * y)


def conv_block_forward(x_nchw, weight_oikk, bias, gamma, beta, alpha,
                       padding=1, eps=1e-5, lane_tile=128):
    """x_nchw: (N, Cin, H, W) f32.  weight_oikk: (Cout, Cin, KH, KW)."""
    N, Cin, H, W = x_nchw.shape
    Cout, Cin_w, KH, KW = weight_oikk.shape
    assert Cin_w == Cin, "groups != 1 is not supported"

    M = N * H * W                 # spatial*batch dim -> 128-lane axis
    K = KH * KW * Cin             # im2col contraction dim

    # Lane tile along M.  At real superres shapes pick ~512 lanes (v5e/v6e) or
    # ~256 (v7x, 64 MiB VMEM) and budget 2x double-buffered bf16 patch tiles +
    # 2x f32 output tiles against vmem_limit_bytes.
    tm = lane_tile if (M % lane_tile == 0) else M
    num_tiles = M // tm

    # ---- wrapper-side im2col + layout plumbing (channel-major operands) ----
    x_nhwc = jnp.transpose(x_nchw, (0, 2, 3, 1)).astype(jnp.float32)
    xpad = jnp.pad(x_nhwc, ((0, 0), (padding, padding), (padding, padding), (0, 0)))
    taps = [xpad[:, kh:kh + H, kw:kw + W, :]          # (N, H, W, Cin) per tap
            for kh in range(KH) for kw in range(KW)]
    patches = jnp.concatenate(taps, axis=-1).reshape(M, K)    # (M, K)
    patches_T = patches.T.astype(jnp.bfloat16)                # (K, M)  bf16

    w_T = jnp.transpose(weight_oikk, (0, 2, 3, 1)).reshape(Cout, K)
    w_T = w_T.astype(jnp.bfloat16)                            # (Cout, K) bf16
    b_col = bias.reshape(Cout, 1).astype(jnp.float32)         # (Cout, 1)

    # ---- pass 1: conv(+bias) slab and per-channel partial sum / sumsq ----
    conv_cm, psum, psq = pl.pallas_call(
        _conv_stats_kernel,
        grid=(num_tiles,),
        in_specs=[
            pl.BlockSpec((K, tm), lambda i: (0, i)),          # patches^T tile
            pl.BlockSpec((Cout, K), lambda i: (0, 0)),        # weights (resident)
            pl.BlockSpec((Cout, 1), lambda i: (0, 0)),        # bias
        ],
        out_specs=[
            pl.BlockSpec((Cout, tm), lambda i: (0, i)),       # conv slab (lane-dense)
            pl.BlockSpec((Cout, tm), lambda i: (0, 0)),       # resident sum acc
            pl.BlockSpec((Cout, tm), lambda i: (0, 0)),       # resident sumsq acc
        ],
        out_shape=[
            jax.ShapeDtypeStruct((Cout, M), jnp.float32),
            jax.ShapeDtypeStruct((Cout, tm), jnp.float32),
            jax.ShapeDtypeStruct((Cout, tm), jnp.float32),
        ],
        compiler_params=pltpu.CompilerParams(
            dimension_semantics=("arbitrary",),   # stats reduce over the M tiles
            vmem_limit_bytes=32 * 1024 * 1024),
    )(patches_T, w_T, b_col)

    # ---- fold global batch statistics into per-channel scale/shift (O(Cout)) ----
    count = jnp.asarray(M, jnp.float32)
    ch_sum = jnp.sum(psum, axis=1)                            # (Cout,)
    ch_sqsum = jnp.sum(psq, axis=1)                           # (Cout,)
    mean = ch_sum / count
    var = jnp.maximum(ch_sqsum / count - mean * mean, 0.0)    # biased (train-mode)
    inv_std = jax.lax.rsqrt(var + eps)
    g = gamma.astype(jnp.float32)
    scale = (g * inv_std).reshape(Cout, 1)
    shift = (beta.astype(jnp.float32) - mean * g * inv_std).reshape(Cout, 1)
    alpha_smem = jnp.asarray(alpha, jnp.float32).reshape(1)

    # ---- pass 2: normalize + affine + PReLU, fully parallel over M tiles ----
    out_cm = pl.pallas_call(
        _bn_prelu_kernel,
        grid=(num_tiles,),
        in_specs=[
            pl.BlockSpec((Cout, tm), lambda i: (0, i)),
            pl.BlockSpec((Cout, 1), lambda i: (0, 0)),
            pl.BlockSpec((Cout, 1), lambda i: (0, 0)),
            pl.BlockSpec(memory_space=pltpu.MemorySpace.SMEM),   # scalar alpha
        ],
        out_specs=pl.BlockSpec((Cout, tm), lambda i: (0, i)),
        out_shape=jax.ShapeDtypeStruct((Cout, M), jnp.float32),
        compiler_params=pltpu.CompilerParams(
            dimension_semantics=("parallel",),    # shard across TCs on v7x
            vmem_limit_bytes=32 * 1024 * 1024),
    )(conv_cm, scale, shift, alpha_smem)

    # (Cout, N*H*W) -> NCHW
    return jnp.transpose(out_cm.reshape(Cout, N, H, W), (1, 0, 2, 3))


def _reference(x_nchw, weight, bias, gamma, beta, alpha, padding=1, eps=1e-5):
    # Pure-JAX f32 reference (NCHW conv + train-mode BN + PReLU).
    y = jax.lax.conv_general_dilated(
        x_nchw, weight, window_strides=(1, 1),
        padding=[(padding, padding), (padding, padding)],
        dimension_numbers=("NCHW", "OIHW", "NCHW"))
    y = y + bias.reshape(1, -1, 1, 1)
    mean = jnp.mean(y, axis=(0, 2, 3), keepdims=True)
    var = jnp.mean((y - mean) ** 2, axis=(0, 2, 3), keepdims=True)
    y = (y - mean) * jax.lax.rsqrt(var + eps)
    y = y * gamma.reshape(1, -1, 1, 1) + beta.reshape(1, -1, 1, 1)
    return jnp.where(y >= 0, y, alpha * y)


if __name__ == "__main__":
    # Module config: conv_block(in_nc=4, out_nc=8, ..., kernel_size=3, padding=1)
    N, in_nc, H, W = 2, 4, 16, 16
    out_nc, Ksz, padding = 8, 3, 1

    key = jax.random.PRNGKey(0)
    k_x, k_w, k_b = jax.random.split(key, 3)

    x = jax.random.normal(k_x, (N, in_nc, H, W), jnp.float32)
    # Deterministic parameters (shapes of nn.Conv2d / BatchNorm2d / PReLU).
    weight = 0.1 * jax.random.normal(k_w, (out_nc, in_nc, Ksz, Ksz), jnp.float32)
    bias = 0.1 * jax.random.normal(k_b, (out_nc,), jnp.float32)
    gamma = jnp.ones((out_nc,), jnp.float32)    # BatchNorm2d weight init
    beta = jnp.zeros((out_nc,), jnp.float32)    # BatchNorm2d bias init
    alpha = jnp.array(0.25, jnp.float32)        # PReLU default init

    out = conv_block_forward(x, weight, bias, gamma, beta, alpha, padding=padding)
    out = jax.block_until_ready(out)

    ref = jax.block_until_ready(
        _reference(x, weight, bias, gamma, beta, alpha, padding=padding))

    assert out.shape == (N, out_nc, H, W)
    # bf16 MXU operands with f32 accumulation vs a pure-f32 reference.
    assert np.allclose(np.asarray(out), np.asarray(ref), rtol=2e-2, atol=2e-2)
    print("KERNEL_OK")
</pallas_src>

<mosaic_0001>
module attributes {stable_mosaic.version = 11 : i64} {
  func.func @_conv_stats_kernel(%arg0: i32, %arg1: memref<36x128xbf16, #tpu.memory_space<vmem>>, %arg2: memref<8x36xbf16, #tpu.memory_space<vmem>>, %arg3: memref<8x1xf32, #tpu.memory_space<vmem>>, %arg4: memref<8x128xf32, #tpu.memory_space<vmem>>, %arg5: memref<8x128xf32, #tpu.memory_space<vmem>>, %arg6: memref<8x128xf32, #tpu.memory_space<vmem>>) attributes {dimension_semantics = [#tpu.dimension_semantics<arbitrary>], iteration_bounds = array<i64: 4>, scalar_prefetch = 0 : i64, scratch_operands = 0 : i64, tpu.core_type = #tpu.core_type<tc>, window_params = [{transform_indices = @transform_0, window_bounds = array<i64: 36, 128>}, {pipeline_mode = #tpu.pipeline_mode<synchronous>, transform_indices = @transform_1, window_bounds = array<i64: 8, 36>}, {pipeline_mode = #tpu.pipeline_mode<synchronous>, transform_indices = @transform_2, window_bounds = array<i64: 8, 1>}, {transform_indices = @transform_3, window_bounds = array<i64: 8, 128>}, {pipeline_mode = #tpu.pipeline_mode<synchronous>, transform_indices = @transform_4, window_bounds = array<i64: 8, 128>}, {pipeline_mode = #tpu.pipeline_mode<synchronous>, transform_indices = @transform_5, window_bounds = array<i64: 8, 128>}]} {
    %c0_i32 = arith.constant 0 : i32
    %0 = arith.cmpi eq, %arg0, %c0_i32 : i32
    %1 = arith.extui %0 : i1 to i32
    %c0_i32_0 = arith.constant 0 : i32
    %2 = arith.cmpi ne, %1, %c0_i32_0 : i32
    scf.if %2 {
      %cst_16 = arith.constant 0.000000e+00 : f32
      %17 = vector.broadcast %cst_16 : f32 to vector<8x128xf32>
      %c0_17 = arith.constant 0 : index
      %c0_18 = arith.constant 0 : index
      %18 = vector.load %arg5[%c0_17, %c0_18] : memref<8x128xf32, #tpu.memory_space<vmem>>, vector<8x128xf32>
      tpu.vector_store %arg5[%c0_17, %c0_18], %17 {strides = array<i32>} : memref<8x128xf32, #tpu.memory_space<vmem>>, vector<8x128xf32>,
      %cst_19 = arith.constant 0.000000e+00 : f32
      %19 = vector.broadcast %cst_19 : f32 to vector<8x128xf32>
      %c0_20 = arith.constant 0 : index
      %c0_21 = arith.constant 0 : index
      %20 = vector.load %arg6[%c0_20, %c0_21] : memref<8x128xf32, #tpu.memory_space<vmem>>, vector<8x128xf32>
      tpu.vector_store %arg6[%c0_20, %c0_21], %19 {strides = array<i32>} : memref<8x128xf32, #tpu.memory_space<vmem>>, vector<8x128xf32>,
    } else {
    }
    %c0 = arith.constant 0 : index
    %c0_1 = arith.constant 0 : index
    %3 = vector.load %arg2[%c0, %c0_1] : memref<8x36xbf16, #tpu.memory_space<vmem>>, vector<8x36xbf16>
    %c0_2 = arith.constant 0 : index
    %c0_3 = arith.constant 0 : index
    %4 = vector.load %arg1[%c0_2, %c0_3] : memref<36x128xbf16, #tpu.memory_space<vmem>>, vector<36x128xbf16>
    %cst = arith.constant dense<0.000000e+00> : vector<8x128xf32>
    %5 = tpu.matmul %3, %4, %cst {dimension_numbers = #tpu.dot_dimension_numbers<[1], [0], [0], [1], [0, 0, 1, 1], [], []>} : vector<8x36xbf16>, vector<36x128xbf16>, vector<8x128xf32> -> vector<8x128xf32>
    %c0_4 = arith.constant 0 : index
    %c0_5 = arith.constant 0 : index
    %6 = vector.load %arg3[%c0_4, %c0_5] : memref<8x1xf32, #tpu.memory_space<vmem>>, vector<8x1xf32>
    %7 = vector.broadcast %6 : vector<8x1xf32> to vector<8x128xf32>
    %8 = arith.addf %5, %7 : vector<8x128xf32>
    %c0_6 = arith.constant 0 : index
    %c0_7 = arith.constant 0 : index
    %9 = vector.load %arg4[%c0_6, %c0_7] : memref<8x128xf32, #tpu.memory_space<vmem>>, vector<8x128xf32>
    tpu.vector_store %arg4[%c0_6, %c0_7], %8 {strides = array<i32>} : memref<8x128xf32, #tpu.memory_space<vmem>>, vector<8x128xf32>,
    %c0_8 = arith.constant 0 : index
    %c0_9 = arith.constant 0 : index
    %10 = vector.load %arg5[%c0_8, %c0_9] : memref<8x128xf32, #tpu.memory_space<vmem>>, vector<8x128xf32>
    %11 = arith.addf %10, %8 : vector<8x128xf32>
    %c0_10 = arith.constant 0 : index
    %c0_11 = arith.constant 0 : index
    %12 = vector.load %arg5[%c0_10, %c0_11] : memref<8x128xf32, #tpu.memory_space<vmem>>, vector<8x128xf32>
    tpu.vector_store %arg5[%c0_10, %c0_11], %11 {strides = array<i32>} : memref<8x128xf32, #tpu.memory_space<vmem>>, vector<8x128xf32>,
    %c0_12 = arith.constant 0 : index
    %c0_13 = arith.constant 0 : index
    %13 = vector.load %arg6[%c0_12, %c0_13] : memref<8x128xf32, #tpu.memory_space<vmem>>, vector<8x128xf32>
    %14 = arith.mulf %8, %8 : vector<8x128xf32>
    %15 = arith.addf %13, %14 : vector<8x128xf32>
    %c0_14 = arith.constant 0 : index
    %c0_15 = arith.constant 0 : index
    %16 = vector.load %arg6[%c0_14, %c0_15] : memref<8x128xf32, #tpu.memory_space<vmem>>, vector<8x128xf32>
    tpu.vector_store %arg6[%c0_14, %c0_15], %15 {strides = array<i32>} : memref<8x128xf32, #tpu.memory_space<vmem>>, vector<8x128xf32>,
    return
  }
  func.func @transform_0(%arg0: i32) -> (i32, i32) {
    %c0_i32 = arith.constant 0 : i32
    %c0_i32_0 = arith.constant 0 : i32
    return %c0_i32, %arg0 : i32, i32
  }
  func.func @transform_1(%arg0: i32) -> (i32, i32) {
    %c0_i32 = arith.constant 0 : i32
    %c0_i32_0 = arith.constant 0 : i32
    %c0_i32_1 = arith.constant 0 : i32
    return %c0_i32, %c0_i32_0 : i32, i32
  }
  func.func @transform_2(%arg0: i32) -> (i32, i32) {
    %c0_i32 = arith.constant 0 : i32
    %c0_i32_0 = arith.constant 0 : i32
    %c0_i32_1 = arith.constant 0 : i32
    return %c0_i32, %c0_i32_0 : i32, i32
  }
  func.func @transform_3(%arg0: i32) -> (i32, i32) {
    %c0_i32 = arith.constant 0 : i32
    %c0_i32_0 = arith.constant 0 : i32
    return %c0_i32, %arg0 : i32, i32
  }
  func.func @transform_4(%arg0: i32) -> (i32, i32) {
    %c0_i32 = arith.constant 0 : i32
    %c0_i32_0 = arith.constant 0 : i32
    %c0_i32_1 = arith.constant 0 : i32
    return %c0_i32, %c0_i32_0 : i32, i32
  }
  func.func @transform_5(%arg0: i32) -> (i32, i32) {
    %c0_i32 = arith.constant 0 : i32
    %c0_i32_0 = arith.constant 0 : i32
    %c0_i32_1 = arith.constant 0 : i32
    return %c0_i32, %c0_i32_0 : i32, i32
  }
}

</mosaic_0001>

<bundles_post_ra>
// kernel: tpu_custom_call.1
= control target key start
LH: loop header
LB: loop body
LE: loop exit
PB: predicated region body
PF: predicated region fallthrough
CT: control target
= control target key end

     0   :  { %11 = vsyncpa [#allocation3], 0  ;;  %s981_s0 = inlined_call_operand.hbm [shape: bf16[36,512], index: 0, kind: input, shape index: {}]   ;;  %s982_s1 = inlined_call_operand.vmem [shape: bf16[8,36], index: 1, kind: input, shape index: {}]   ;;  %s983_s2 = inlined_call_operand.vmem [shape: f32[8,1], index: 2, kind: input, shape index: {}]   ;;  %s984_s3 = inlined_call_operand.hbm [shape: f32[8,512], index: 3, kind: output, shape index: {0}]   ;;  %s985_s4 = inlined_call_operand.hbm [shape: f32[8,128], index: 4, kind: output, shape index: {1}]   ;;  %s986_s5 = inlined_call_operand.hbm [shape: f32[8,128], index: 5, kind: output, shape index: {2}]  }
   0x1   :  { %13 = vsyncpa [#allocation3 + $0x1], 0 }
   0x2   :  { %14 = vsyncpa [#allocation4], 0 }
   0x3   :  { %16 = vsyncpa [#allocation4 + $0x1], 0 }
   0x4   :  { %17 = vsyncpa [#allocation7], 0  ;;  %s756_s18 = smov 0   ;;  %s758_s19 = smov 0  }
   0x5   :  { %s760_s20 = smov 0   ;;  %s762_s21 = smov 0  }
   0x6 LB: > { %s777_s22 = sadd.s32 4294967295, %s713_s21   ;;  %s455_s23 = sadd.s32 4294967294, %s713_s21   ;;  %s713_s21 = sphi %s762_s21, %s1007_s21   ;;  %s709_s20 = sphi %s760_s20, %s1006_s20   ;;  %s705_s19 = sphi %s758_s19, %s1005_s19   ;;  %s701_s18 = sphi %s756_s18, %s1004_s18  }
   0x7   : > { %s781_s24 = sadd.s32 1, %s713_s21   ;;  %s30_s25 = sadd.s32 1, %s709_s20 }
   0x8   : > { %s27_s26 = ssub.s32 %s713_s21, %s781_s24  ;;  %p37_p0 = scmp.ne.s32.totalorder %s709_s20, %s705_s19 }
   0x9   : > { %p28_p1 = scmp.eq.s32.totalorder %s27_s26, 0  ;;  %p38_p2 = scmp.eq.s32.totalorder %s713_s21, 0 }
   0xa   : > { %p43_p3 = scmp.ne.s32.totalorder %s705_s19, %s701_s18  ;;  %p44_p4 = scmp.eq.s32.totalorder %s777_s22, 0 }
   0xb   : > { %s793_s27 = scalar_select %p28_p1, %s709_s20, %s30_s25  }
   0xc   : > { %p39_p5 = por %p38_p2, %p37_p0  ;;  %p795_p6 = por %p44_p4, %p43_p3 }
   0xd   : > { %p987_p7 = scmp.eq.s32.totalorder %s777_s22, 3  ;;  %p115_p8 = scmp.eq.s32.totalorder %s455_s23, 3 }
   0xe   : > { %p510_p9 = scmp.lt.s32.totalorder %s713_s21, 4  ;;  %s183_s6 = sand.u32 1, %s709_s20  }
   0xf   : > { %p803_p10 = por %p987_p7, %p37_p0  ;;  %p807_p11 = por %p115_p8, %p43_p3 }
  0x10   : > { %s458_s7 = sshll.u32 %s713_s21, 6  ;;  %s488_s8 = smul.u32 20, %s183_s6 }
  0x11   : > { %s990_s29 = scalar_select %p803_p10, 1, 0 }
  0x12   : > { %s991_s30 = scalar_select %p807_p11, 1, 0 }
  0x13   : > { %s816_s11 = scalar_lea.hbm %s981_s0, %s458_s7  ;;  %p818_p12 = pnand %p510_p9, %p39_p5 }
  0x14   : > { %s187_s13 = scalar_lea.vmem [#allocation2], %s488_s8  ;;  %s825_s15 = scalar_lea.sflag [#allocation3], %s183_s6 }
  0x15   : > { %s193_s14 = sshll.u32 %s187_s13, 4  ;;  %s561_s16 = scalar_lea.hbm %s816_s11, 320  ;;  %s822_s14 = int_to_ptr.vmem [resolvable:$true] %s193_s14 }
  0x16   : > { %p562_p0 = scmp.ne.s32.totalorder %s816_s11, %s561_s16  ;;  %p563_p1 = pneg %p818_p12 }
  0x17   : > { %s566_s25 = scalar_lea.hbm %s981_s0, 1280  ;;  %p567_p4 = scmp.lt.u32.totalorder %s816_s11, %s981_s0 }
  0x18   : > { %p564_p2 = pnand %p563_p1, %p562_p0  ;;  %p568_p5 = scmp.lt.u32.totalorder %s566_s25, %s561_s16 }
  0x19   : > { %p570_p9 = scmp.lt.u32.totalorder %s561_s16, %s816_s11 }
  0x1a   : > { %p565_p3 = pneg %p564_p2  ;;  %p569_p8 = por %p568_p5, %p567_p4 }
  0x1c   : > { %p571_p7 = por %p570_p9, %p569_p8 }
  0x1e   : > { %p572_p13 = pnand %p571_p7, %p565_p3 }
  0x20   : > { %575 = shalt.err (!%p572_p13)
}
  0x21   : > { %s576_s6 = scalar_lea.vmem %s822_s14, 320  ;;  %s715_s8 = smov [#allocation2]  }
  0x22   : > { %p577_p0 = scmp.ne.s32.totalorder %s822_s14, %s576_s6  ;;  %s581_s9 = sshll.u32 %s715_s8, 4  ;;  %s582_s9 = int_to_ptr.vmem [resolvable:$false] %s581_s9 }
  0x23   : > { %s583_s10 = scalar_lea.vmem %s582_s9, 640  ;;  %p584_p10 = scmp.lt.s32.totalorder %s822_s14, %s582_s9 }
  0x24   : > { %p579_p2 = pnand %p577_p0, %p563_p1  ;;  %p585_p4 = scmp.lt.s32.totalorder %s583_s10, %s576_s6 }
  0x26   : > { %p580_p11 = pneg %p579_p2  ;;  %p586_p5 = por %p585_p4, %p584_p10 }
  0x28   : > { %p587_p8 = pnand %p586_p5, %p580_p11 }
  0x2a   : > { %590 = shalt.err (!%p587_p8)
}
  0x2b   : > { %s716_s13 = smov 256   ;;  %s717_s16 = smov 64  }
  0x2c   : > { %s718_s17 = smov 4   ;;  %p201_p7 = scmp.lt.s32.totalorder %s713_s21, 5 }
  0x2d   : > { %505 = dma.hbm_to_vmem [thread:$0]  (!%p818_p12), %s816_s11, 320, %s822_s14, %s825_s15, %s716_s13, %s717_s16, %s718_s17  }
  0x2e   : > { %p993_p13 = scmp.ge.s32.totalorder %s713_s21, 1 }
  0x30   : > { %p202_p1 = pnand %p993_p13, %p201_p7 }
  0x31   : > { %s857_s23 = sand.u32 (!%p202_p1), 1, %s705_s19  }
  0x32   : > { %205 = sbr.rel (%p202_p1) target bundleno = 356 (0x164), region = 32  ;;  %s208_s26 = scalar_lea.sflag (!%p202_p1), [#allocation3], %s857_s23 }
  0x33   : > { %s489_s25 = smul.u32 (!%p202_p1), 20, %s857_s23 }
  0x35   : > { %s211_s7 = scalar_lea.vmem (!%p202_p1), [#allocation2], %s489_s25 }
  0x39   : > { %688 = dma.done.wait (%p795_p6), %s208_s26, 320  }
  0x3a   : > { %690 = vsyncadd (%p795_p6), %s208_s26, 4294966976  ;;  %s460_s11 = sshll.u32 %s857_s23, 3  ;;  %p461_p10 = scmp.ne.s32.totalorder %s777_s22, 0 }
  0x3b   : > { %s866_s12 = scalar_lea.vmem [#allocation5], %s460_s11  ;;  %v719_v0 = vmov (!%p461_p10), 0.0  }
  0x3c   : > { %242 = sbr.rel (%p461_p10) target bundleno = 67 (0x43), region = 40  ;;  %243 = vst [vmem:[#allocation6] sm:$0xff] (!%p461_p10), %v719_v0  ;;  %244 = vst [vmem:[#allocation8] sm:$0xff] (!%p461_p10), %v719_v0 }
  0x43 PF: > { %v558_v1 = vld [vmem:[%s211_s7] sm:$0xff]   ;;  %v720_v2 = vmov 0.0   ;;  %v559_v3 = vld [vmem:[%s211_s7 + $0x8] sm:$0xff]   ;;  %v560_v4 = vld [vmem:[%s211_s7 + $0x10] ss:$0 sps:$4 sm:$0x33]  }
  0x44   : > { %478 = vmatprep.subr.bf16.mxu0 %v720_v2  ;;  %vm721_vm0 = vmmov 0   ;;  %v251_v5 = vld [vmem:[%s983_s2] sm:$0xff]  ;;  %vm276_vm1 = vcmask 1041408   ;;  %v722_v6 = vmov 0   ;;  %vm272_vm2 = vcmask 293888   ;;  %s467_s8 = sshll.u32 %s777_s22, 7 }
  0x45   : > { %479 = vmatpush3.bf16.msra.mxu0 %v558_v1  ;;  %484 = vmatprep.mubr.msk.bf16.mxu0 %vm721_vm0, %v720_v2  ;;  %v278_v7 = vsel %vm276_vm1, %v560_v4, 0  ;;  %v245_v8 = vld [vmem:[%s982_s1] sm:$0xf]  ;;  %s342_s9 = sshll.u32 %s866_s12, 4  ;;  %v321_v11 = vld [vmem:[#allocation6] sm:$0xff]  ;;  %s723_s10 = smov [#allocation6]   ;;  %s882_s9 = int_to_ptr.vmem [resolvable:$true] %s342_s9 }
  0x46   : > { %480 = vmatprep.subr.bf16.mxu0 %v720_v2  ;;  %557 = vset.pattern.permute.xlu0 %v722_v6  ;;  %s353_s13 = sshll.u32 %s723_s10, 4  ;;  %s880_s25 = scalar_lea.hbm %s984_s3, %s467_s8  ;;  %v324_v15 = vld [vmem:[#allocation8] sm:$0xff]  ;;  %s887_s13 = int_to_ptr.vmem [resolvable:$true] %s353_s13 }
  0x47   : > { %254 = vperm.xlu0 %557, %v251_v5   ;;  %s724_s26 = smov [#allocation8]   ;;  %s329_s11 = scalar_lea.sflag [#allocation4], %s857_s23 }
  0x48   : > { %s884_s7 = sshll.u32 %s724_s26, 4  ;;  %s591_s28 = scalar_lea.vmem %s882_s9, 128  ;;  %s912_s7 = int_to_ptr.vmem [resolvable:$true] %s884_s7 }
  0x49   : > { %481 = vmatpush3.bf16.msra.mxu0 %v559_v3  ;;  %p592_p6 = scmp.ne.s32.totalorder %s882_s9, %s591_s28  ;;  %p994_p11 = scmp.ne.s32.totalorder %s990_s29, 0 }
  0x4a   : > { %482 = vmatprep.subr.bf16.mxu0 %v720_v2  ;;  %s725_s14 = smov [#allocation5]  }
  0x4b   : > { %p593_p12 = pnand %p592_p6, %p994_p11  ;;  %s595_s15 = sshll.u32 %s725_s14, 4  ;;  %s596_s15 = int_to_ptr.vmem [resolvable:$false] %s595_s15 }
  0x4c   : > { %s597_s6 = scalar_lea.vmem %s596_s15, 256  ;;  %p598_p9 = scmp.lt.s32.totalorder %s882_s9, %s596_s15 }
  0x4d   : > { %483 = vmatpush3.bf16.msra.mxu0 %v278_v7  ;;  %p594_p3 = pneg %p593_p12  ;;  %p599_p0 = scmp.lt.s32.totalorder %s597_s6, %s591_s28 }
  0x4f   : > { %p600_p2 = por %p599_p0, %p598_p9 }
  0x50   : > { %485 = vmatmul.mubr.msk.bf16.vlgmr.msra.gmra.mrb[0].mxu0 %vm272_vm2, %v245_v8 }
  0x51   : > { %p601_p4 = pnand %p600_p2, %p594_p3 }
  0xc6   : > { %v255_v9 = vpop.permute.xlu0 %254 }
 0x123   : > { %v314_v10 = vpop.f32.mrb[0].mxu0 }
 0x124   : > { %v315_v12 = vadd.f32 %v314_v10, %v255_v9  ;;  %v486_v13 = vpop.f32.mrb[1].mxu0 }
 0x125   : > { %v317_v14 = vpop.f32.mrb[2].mxu0 }
 0x126   : > { %v325_v16 = vmul.f32 %v315_v12, %v315_v12  ;;  %320 = vst [vmem:[%s866_s12] sm:$0xff] %v315_v12  ;;  %v487_v17 = vpop.f32.mrb[3].mxu0  ;;  %v322_v18 = vadd.f32 %v321_v11, %v315_v12 }
 0x127   : > { %604 = shalt.err (!%p601_p4)
}
 0x128   : > { %s605_s23 = scalar_lea.hbm %s880_s25, 128  ;;  %s609_s10 = scalar_lea.hbm %s984_s3, 512 }
 0x129   : > { %p606_p5 = scmp.ne.s32.totalorder %s880_s25, %s605_s23  ;;  %p610_p13 = scmp.lt.u32.totalorder %s880_s25, %s984_s3 }
 0x12a   : > { %p611_p1 = scmp.lt.u32.totalorder %s609_s10, %s605_s23  ;;  %p613_p6 = scmp.lt.u32.totalorder %s605_s23, %s880_s25 }
 0x12b   : > { %p607_p8 = pnand %p606_p5, %p994_p11 }
 0x12c   : > { %p612_p10 = por %p611_p1, %p610_p13 }
 0x12d   : > { %p608_p7 = pneg %p607_p8 }
 0x12e   : > { %p614_p12 = por %p613_p6, %p612_p10 }
 0x130   : > { %p615_p3 = pnand %p614_p12, %p608_p7 }
 0x132   : > { %618 = shalt.err (!%p615_p3)
}
 0x133   : > { %492 = dma.vmem_to_hbm [thread:$0]  (%p994_p11), %s882_s9, 128, %s880_s25, %s329_s11   ;;  %323 = vst [vmem:[#allocation6] sm:$0xff] %v322_v18  ;;  %v326_v19 = vadd.f32 %v325_v16, %v324_v15 }
 0x134   : > { %s619_s26 = scalar_lea.vmem %s887_s13, 128  ;;  %p995_p0 = scmp.eq.s32.totalorder %s777_s22, 3 }
 0x135   : > { %p620_p9 = scmp.ne.s32.totalorder %s887_s13, %s619_s26  ;;  %p626_p5 = scmp.lt.s32.totalorder %s887_s13, %s887_s13 }
 0x136   : > { %p627_p8 = scmp.lt.s32.totalorder %s619_s26, %s619_s26 }
 0x137   : > { %p621_p2 = pnand %p620_p9, %p995_p0 }
 0x138   : > { %p628_p7 = por %p627_p8, %p626_p5 }
 0x139   : > { %p622_p4 = pneg %p621_p2 }
 0x13b   : > { %p629_p13 = pnand %p628_p7, %p622_p4 }
 0x13d   : > { %632 = shalt.err (!%p629_p13)
}
 0x13e   : > { %s633_s9 = scalar_lea.hbm %s985_s4, 128  ;;  %p996_p1 = pmov %p995_p0 }
 0x13f   : > { %p634_p11 = scmp.ne.s32.totalorder %s985_s4, %s633_s9  ;;  %p639_p12 = scmp.lt.u32.totalorder %s633_s9, %s985_s4 }
 0x141   : > { %p635_p10 = pnand %p634_p11, %p996_p1 }
 0x143   : > { %p636_p6 = pneg %p635_p10 }
 0x145   : > { %p641_p3 = pnand %p639_p12, %p636_p6 }
 0x147   : > { %644 = shalt.err (!%p641_p3)
}
 0x148   : > { %p997_p9 = pmov %p995_p0  ;;  %327 = vst [vmem:[#allocation8] sm:$0xff] %v326_v19  ;;  %s645_s12 = scalar_lea.vmem %s912_s7, 128 }
 0x149   : > { %p646_p0 = scmp.ne.s32.totalorder %s912_s7, %s645_s12  ;;  %p998_p2 = pmov %p996_p1 }
 0x14a   : > { %494 = dma.vmem_to_hbm [thread:$0]  (%p997_p9), %s887_s13, 128, %s985_s4, [#allocation7]  }
 0x14b   : > { %p647_p4 = pnand %p646_p0, %p998_p2  ;;  %p652_p8 = scmp.lt.s32.totalorder %s912_s7, %s912_s7 }
 0x14c   : > { %p653_p7 = scmp.lt.s32.totalorder %s645_s12, %s645_s12 }
 0x14d   : > { %p648_p5 = pneg %p647_p4 }
 0x14e   : > { %p654_p13 = por %p653_p7, %p652_p8 }
 0x150   : > { %p655_p11 = pnand %p654_p13, %p648_p5 }
 0x152   : > { %658 = shalt.err (!%p655_p11)
}
 0x153   : > { %s659_s16 = scalar_lea.hbm %s986_s5, 128  ;;  %p999_p10 = pmov %p998_p2 }
 0x154   : > { %p660_p1 = scmp.ne.s32.totalorder %s986_s5, %s659_s16  ;;  %p665_p3 = scmp.lt.u32.totalorder %s659_s16, %s986_s5 }
 0x156   : > { %p661_p6 = pnand %p660_p1, %p999_p10 }
 0x158   : > { %p662_p12 = pneg %p661_p6 }
 0x15a   : > { %p667_p9 = pnand %p665_p3, %p662_p12 }
 0x15c   : > { %670 = shalt.err (!%p667_p9)
}
 0x15d   : > { %p1000_p0 = pmov %p998_p2 }
 0x15f   : > { %496 = dma.vmem_to_hbm [thread:$0]  (%p1000_p0), %s912_s7, 128, %s986_s5, [#allocation7]  }
 0x160   : > { %p1001_p2 = pmov %p1000_p0 }
 0x161   : > { %p1002_p4 = pmov %p1000_p0 }
 0x162   : > { %692 = dma.done.wait (%p1001_p2), [#allocation7], 256  }
 0x163   : > { %694 = vsyncadd (%p1002_p4), [#allocation7], 4294967040 }
 0x164 PF: > { %p515_p5 = scmp.ge.s32.totalorder %s713_s21, 2  ;;  %s384_s25 = sand.u32 1, %s701_s18  }
 0x165   : > { %p1003_p8 = scmp.ne.s32.totalorder %s991_s30, 0  ;;  %s385_s11 = scalar_lea.sflag [#allocation4], %s384_s25 }
 0x167   : > { %p507_p7 = pnand %p515_p5, %p1003_p8 }
 0x169   : > { %696 = dma.done.wait (!%p507_p7), %s385_s11, 128  }
 0x16a   : > { %698 = vsyncadd (!%p507_p7), %s385_s11, 4294967168  ;;  %p20_p13 = scmp.ge.s32.totalorder %s781_s24, 6   ;;  %s1004_s18 = smov %s705_s19 }
 0x16b   : > { %s1005_s19 = smov %s709_s20  ;;  %s1006_s20 = smov %s793_s27 }
 0x16c   : > { %s1007_s21 = smov %s781_s24  ;;  %22 = sbr.rel (!%p20_p13) target bundleno = 6 (0x6), region = 97 }
 0x173   :  { %390 = vsyncpa [#allocation3], 1 }
 0x174   :  { %392 = vsyncpa [#allocation3 + $0x1], 1 }
 0x175   :  { %393 = vsyncpa [#allocation4], 1 }
 0x176   :  { %395 = vsyncpa [#allocation4 + $0x1], 1 }
 0x177   :  { %396 = vsyncpa [#allocation7], 1 }

</bundles_post_ra>
